<compile_context>
chip_gen: v5e
topology: v5e:2x2
jax: 0.10.0
libtpu: 0.0.40
codegen_flags: <defaults>
</compile_context>

<pallas_src>
import jax
import jax.numpy as jnp
from jax.experimental import pallas as pl
from jax.experimental.pallas import tpu as pltpu


def _twinq_kernel(x_ref, w1_ref, b1_ref, w2_ref, b2_ref, w3_ref, b3_ref, o_ref):
    x = x_ref[...]
    # Fused layer 1: both trunks at once (2*hid output columns).
    h = jnp.dot(x, w1_ref[...], preferred_element_type=jnp.float32)
    h = jnp.maximum(h + b1_ref[...], 0.0)                       # ReLU (f32, VPU)
    # Fused layer 2: block-diagonal weight keeps the trunks independent.
    h = jnp.dot(h, w2_ref[...], preferred_element_type=jnp.float32)
    h = jnp.maximum(h + b2_ref[...], 0.0)                       # ReLU (f32, VPU)
    # Fused head: single (tm, 2*hid) x (2*hid, 2) dot + (1, 2) bias.
    out = jnp.dot(h, w3_ref[...], preferred_element_type=jnp.float32) + b3_ref[...]
    o_ref[...] = out.astype(o_ref.dtype)


def _round_up(v, m):
    return ((v + m - 1) // m) * m


def _pick_tm(batch):
    # Prefer large tiles (amortize per-grid-step overhead) while keeping >= 2 tiles
    # so v7x's two TensorCores both get work on the "parallel" batch axis.
    tm = _round_up(max(pl.cdiv(batch, 2), 8), 8)
    return min(tm, 1024)


def model_twinq_forward(obs, act, params, *, tm=None, input_dtype=None):
    """obs: [B, obs_size] f32, act: [B, act_size] f32. Returns (q1, q2), each [B, 1]."""
    B, obs_size = obs.shape
    act_size = act.shape[1]
    hid = params["q1"]["w2"].shape[0]
    in_size = obs_size + act_size

    # torch.cat([obs, act], dim=1) done once in the wrapper (plain XLA).
    x = jnp.concatenate([obs, act], axis=1)                      # (B, in_size)

    # ---- fuse the twin trunks into one weight set ----
    p1, p2 = params["q1"], params["q2"]
    w1 = jnp.concatenate([p1["w1"], p2["w1"]], axis=1)           # (in, 2*hid)
    b1 = jnp.concatenate([p1["b1"], p2["b1"]], axis=1)           # (1, 2*hid)
    w2 = (jnp.zeros((2 * hid, 2 * hid), jnp.float32)             # block-diagonal
          .at[:hid, :hid].set(p1["w2"])
          .at[hid:, hid:].set(p2["w2"]))
    b2 = jnp.concatenate([p1["b2"], p2["b2"]], axis=1)           # (1, 2*hid)
    w3 = (jnp.zeros((2 * hid, 2), jnp.float32)                   # q1 -> col 0, q2 -> col 1
          .at[:hid, 0:1].set(p1["w3"])
          .at[hid:, 1:2].set(p2["w3"]))
    b3 = jnp.concatenate([p1["b3"], p2["b3"]], axis=1)           # (1, 2)

    if input_dtype is not None:
        # Optional bf16 streaming of the large operands (v6e/v7x); dots still
        # accumulate in f32 and all elementwise work stays f32 (v5e-safe).
        x = x.astype(input_dtype)
        w1 = w1.astype(input_dtype)

    # ---- batch tiling ----
    if tm is None:
        tm = _pick_tm(B)
    assert tm % 8 == 0, "batch tile must be a multiple of 8 (sublane constraint)"
    nb = pl.cdiv(B, tm)
    b_pad = nb * tm
    if b_pad != B:  # pad batch so every grid step sees a full tile
        x = jnp.pad(x, ((0, b_pad - B), (0, 0)))

    resident = lambda a: pl.BlockSpec(a.shape, lambda i: (0, 0))  # VMEM-resident weights

    out = pl.pallas_call(
        _twinq_kernel,
        out_shape=jax.ShapeDtypeStruct((b_pad, 2), jnp.float32),
        grid=(nb,),
        in_specs=[pl.BlockSpec((tm, in_size), lambda i: (i, 0))]
                 + [resident(a) for a in (w1, b1, w2, b2, w3, b3)],
        out_specs=pl.BlockSpec((tm, 2), lambda i: (i, 0)),
        compiler_params=pltpu.CompilerParams(
            dimension_semantics=("parallel",),   # shard batch across TCs on v7x
        ),
    )(x, w1, b1, w2, b2, w3, b3)

    q1 = out[:B, 0:1]
    q2 = out[:B, 1:2]
    return q1, q2


def init_params(key, obs_size, act_size, hid_size):
    """Xavier-uniform weights (gain=1), zero biases — matches weights_init_."""
    def xavier(k, fan_in, fan_out):
        limit = jnp.sqrt(6.0 / (fan_in + fan_out))
        # stored as (in, out) so forward is x @ W
        return jax.random.uniform(k, (fan_in, fan_out), jnp.float32, -limit, limit)

    def net(k):
        k1, k2, k3 = jax.random.split(k, 3)
        in_size = obs_size + act_size
        return {
            "w1": xavier(k1, in_size, hid_size), "b1": jnp.zeros((1, hid_size), jnp.float32),
            "w2": xavier(k2, hid_size, hid_size), "b2": jnp.zeros((1, hid_size), jnp.float32),
            "w3": xavier(k3, hid_size, 1), "b3": jnp.zeros((1, 1), jnp.float32),
        }

    k1, k2 = jax.random.split(key)
    return {"q1": net(k1), "q2": net(k2)}


def model_twinq_ref(obs, act, params):
    """Pure-JAX reference of the PyTorch forward."""
    x = jnp.concatenate([obs, act], axis=1)

    def mlp(p):
        h = jnp.maximum(x @ p["w1"] + p["b1"], 0.0)
        h = jnp.maximum(h @ p["w2"] + p["b2"], 0.0)
        return h @ p["w3"] + p["b3"]

    return mlp(params["q1"]), mlp(params["q2"])


if __name__ == "__main__":
    obs_size, act_size, hid_size, batch = 16, 4, 32, 256

    key = jax.random.PRNGKey(0)
    ko, ka, kp = jax.random.split(key, 3)
    obs = jax.random.normal(ko, (batch, obs_size), jnp.float32)
    act = jax.random.normal(ka, (batch, act_size), jnp.float32)
    params = init_params(kp, obs_size, act_size, hid_size)

    q1, q2 = model_twinq_forward(obs, act, params)   # auto tm -> 128, nb = 2
    (q1, q2) = jax.block_until_ready((q1, q2))

    r1, r2 = model_twinq_ref(obs, act, params)
    assert q1.shape == (batch, 1) and q2.shape == (batch, 1)
    assert jnp.allclose(q1, r1, atol=1e-4, rtol=1e-4)
    assert jnp.allclose(q2, r2, atol=1e-4, rtol=1e-4)

    print("KERNEL_OK")
</pallas_src>

<mosaic_0001>
module attributes {stable_mosaic.version = 11 : i64} {
  func.func @_twinq_kernel(%arg0: i32, %arg1: memref<128x20xf32, #tpu.memory_space<vmem>>, %arg2: memref<20x64xf32, #tpu.memory_space<vmem>>, %arg3: memref<1x64xf32, #tpu.memory_space<vmem>>, %arg4: memref<64x64xf32, #tpu.memory_space<vmem>>, %arg5: memref<1x64xf32, #tpu.memory_space<vmem>>, %arg6: memref<64x2xf32, #tpu.memory_space<vmem>>, %arg7: memref<1x2xf32, #tpu.memory_space<vmem>>, %arg8: memref<128x2xf32, #tpu.memory_space<vmem>>) attributes {dimension_semantics = [#tpu.dimension_semantics<parallel>], iteration_bounds = array<i64: 2>, scalar_prefetch = 0 : i64, scratch_operands = 0 : i64, tpu.core_type = #tpu.core_type<tc>, window_params = [{transform_indices = @transform_0, window_bounds = array<i64: 128, 20>}, {pipeline_mode = #tpu.pipeline_mode<synchronous>, transform_indices = @transform_1, window_bounds = array<i64: 20, 64>}, {pipeline_mode = #tpu.pipeline_mode<synchronous>, transform_indices = @transform_2, window_bounds = array<i64: 1, 64>}, {pipeline_mode = #tpu.pipeline_mode<synchronous>, transform_indices = @transform_3, window_bounds = array<i64: 64, 64>}, {pipeline_mode = #tpu.pipeline_mode<synchronous>, transform_indices = @transform_4, window_bounds = array<i64: 1, 64>}, {pipeline_mode = #tpu.pipeline_mode<synchronous>, transform_indices = @transform_5, window_bounds = array<i64: 64, 2>}, {pipeline_mode = #tpu.pipeline_mode<synchronous>, transform_indices = @transform_6, window_bounds = array<i64: 1, 2>}, {transform_indices = @transform_7, window_bounds = array<i64: 128, 2>}]} {
    %c0 = arith.constant 0 : index
    %c0_0 = arith.constant 0 : index
    %0 = vector.load %arg1[%c0, %c0_0] : memref<128x20xf32, #tpu.memory_space<vmem>>, vector<128x20xf32>
    %c0_1 = arith.constant 0 : index
    %c0_2 = arith.constant 0 : index
    %1 = vector.load %arg2[%c0_1, %c0_2] : memref<20x64xf32, #tpu.memory_space<vmem>>, vector<20x64xf32>
    %cst = arith.constant dense<0.000000e+00> : vector<128x64xf32>
    %2 = tpu.matmul %0, %1, %cst {dimension_numbers = #tpu.dot_dimension_numbers<[1], [0], [0], [1], [0, 0, 1, 1], [], []>} : vector<128x20xf32>, vector<20x64xf32>, vector<128x64xf32> -> vector<128x64xf32>
    %c0_3 = arith.constant 0 : index
    %c0_4 = arith.constant 0 : index
    %3 = vector.load %arg3[%c0_3, %c0_4] : memref<1x64xf32, #tpu.memory_space<vmem>>, vector<1x64xf32>
    %4 = vector.broadcast %3 : vector<1x64xf32> to vector<128x64xf32>
    %5 = arith.addf %2, %4 : vector<128x64xf32>
    %cst_5 = arith.constant 0.000000e+00 : f32
    %6 = vector.broadcast %cst_5 : f32 to vector<128x64xf32>
    %7 = arith.maximumf %5, %6 : vector<128x64xf32>
    %c0_6 = arith.constant 0 : index
    %c0_7 = arith.constant 0 : index
    %8 = vector.load %arg4[%c0_6, %c0_7] : memref<64x64xf32, #tpu.memory_space<vmem>>, vector<64x64xf32>
    %cst_8 = arith.constant dense<0.000000e+00> : vector<128x64xf32>
    %9 = tpu.matmul %7, %8, %cst_8 {dimension_numbers = #tpu.dot_dimension_numbers<[1], [0], [0], [1], [0, 0, 1, 1], [], []>} : vector<128x64xf32>, vector<64x64xf32>, vector<128x64xf32> -> vector<128x64xf32>
    %c0_9 = arith.constant 0 : index
    %c0_10 = arith.constant 0 : index
    %10 = vector.load %arg5[%c0_9, %c0_10] : memref<1x64xf32, #tpu.memory_space<vmem>>, vector<1x64xf32>
    %11 = vector.broadcast %10 : vector<1x64xf32> to vector<128x64xf32>
    %12 = arith.addf %9, %11 : vector<128x64xf32>
    %cst_11 = arith.constant 0.000000e+00 : f32
    %13 = vector.broadcast %cst_11 : f32 to vector<128x64xf32>
    %14 = arith.maximumf %12, %13 : vector<128x64xf32>
    %c0_12 = arith.constant 0 : index
    %c0_13 = arith.constant 0 : index
    %15 = vector.load %arg6[%c0_12, %c0_13] : memref<64x2xf32, #tpu.memory_space<vmem>>, vector<64x2xf32>
    %cst_14 = arith.constant dense<0.000000e+00> : vector<128x2xf32>
    %16 = tpu.matmul %14, %15, %cst_14 {dimension_numbers = #tpu.dot_dimension_numbers<[1], [0], [0], [1], [0, 0, 1, 1], [], []>} : vector<128x64xf32>, vector<64x2xf32>, vector<128x2xf32> -> vector<128x2xf32>
    %c0_15 = arith.constant 0 : index
    %c0_16 = arith.constant 0 : index
    %17 = vector.load %arg7[%c0_15, %c0_16] : memref<1x2xf32, #tpu.memory_space<vmem>>, vector<1x2xf32>
    %18 = vector.broadcast %17 : vector<1x2xf32> to vector<128x2xf32>
    %19 = arith.addf %16, %18 : vector<128x2xf32>
    %c0_17 = arith.constant 0 : index
    %c0_18 = arith.constant 0 : index
    %20 = vector.load %arg8[%c0_17, %c0_18] : memref<128x2xf32, #tpu.memory_space<vmem>>, vector<128x2xf32>
    tpu.vector_store %arg8[%c0_17, %c0_18], %19 {strides = array<i32>} : memref<128x2xf32, #tpu.memory_space<vmem>>, vector<128x2xf32>,
    return
  }
  func.func @transform_0(%arg0: i32) -> (i32, i32) {
    %c0_i32 = arith.constant 0 : i32
    %c0_i32_0 = arith.constant 0 : i32
    return %arg0, %c0_i32 : i32, i32
  }
  func.func @transform_1(%arg0: i32) -> (i32, i32) {
    %c0_i32 = arith.constant 0 : i32
    %c0_i32_0 = arith.constant 0 : i32
    %c0_i32_1 = arith.constant 0 : i32
    return %c0_i32, %c0_i32_0 : i32, i32
  }
  func.func @transform_2(%arg0: i32) -> (i32, i32) {
    %c0_i32 = arith.constant 0 : i32
    %c0_i32_0 = arith.constant 0 : i32
    %c0_i32_1 = arith.constant 0 : i32
    return %c0_i32, %c0_i32_0 : i32, i32
  }
  func.func @transform_3(%arg0: i32) -> (i32, i32) {
    %c0_i32 = arith.constant 0 : i32
    %c0_i32_0 = arith.constant 0 : i32
    %c0_i32_1 = arith.constant 0 : i32
    return %c0_i32, %c0_i32_0 : i32, i32
  }
  func.func @transform_4(%arg0: i32) -> (i32, i32) {
    %c0_i32 = arith.constant 0 : i32
    %c0_i32_0 = arith.constant 0 : i32
    %c0_i32_1 = arith.constant 0 : i32
    return %c0_i32, %c0_i32_0 : i32, i32
  }
  func.func @transform_5(%arg0: i32) -> (i32, i32) {
    %c0_i32 = arith.constant 0 : i32
    %c0_i32_0 = arith.constant 0 : i32
    %c0_i32_1 = arith.constant 0 : i32
    return %c0_i32, %c0_i32_0 : i32, i32
  }
  func.func @transform_6(%arg0: i32) -> (i32, i32) {
    %c0_i32 = arith.constant 0 : i32
    %c0_i32_0 = arith.constant 0 : i32
    %c0_i32_1 = arith.constant 0 : i32
    return %c0_i32, %c0_i32_0 : i32, i32
  }
  func.func @transform_7(%arg0: i32) -> (i32, i32) {
    %c0_i32 = arith.constant 0 : i32
    %c0_i32_0 = arith.constant 0 : i32
    return %arg0, %c0_i32 : i32, i32
  }
}

</mosaic_0001>

<bundles_post_ra>
// kernel: tpu_custom_call.1
= control target key start
LH: loop header
LB: loop body
LE: loop exit
PB: predicated region body
PF: predicated region fallthrough
CT: control target
= control target key end

     0   :  { %s917_s24 = smov 0   ;;  %s1125_s0 = inlined_call_operand.vmem [shape: f32[256,20], index: 0, kind: input, shape index: {}]   ;;  %s1126_s1 = inlined_call_operand.vmem [shape: f32[20,64], index: 1, kind: input, shape index: {}]   ;;  %s1127_s2 = inlined_call_operand.vmem [shape: f32[1,64], index: 2, kind: input, shape index: {}]   ;;  %s1128_s3 = inlined_call_operand.vmem [shape: f32[64,64], index: 3, kind: input, shape index: {}]   ;;  %s1129_s4 = inlined_call_operand.vmem [shape: f32[1,64], index: 4, kind: input, shape index: {}]   ;;  %s1130_s5 = inlined_call_operand.vmem [shape: f32[64,2], index: 5, kind: input, shape index: {}]   ;;  %s1131_s6 = inlined_call_operand.vmem [shape: f32[1,2], index: 6, kind: input, shape index: {}]   ;;  %s1132_s7 = inlined_call_operand.vmem [shape: f32[256,2], index: 7, kind: output, shape index: {}]  }
   0x1 LB: > { %s779_s25 = sadd.s32 4294967295, %s875_s24   ;;  %p783_p0 = scmp.ge.s32.totalorder %s875_s24, 1  ;;  %s875_s24 = sphi %s917_s24, %s17_s24  }
   0x2   : > { %p238_p1 = scmp.lt.s32.totalorder %s875_s24, 3 }
   0x4   : > { %p239_p2 = pnand %p783_p0, %p238_p1 }
   0x5   : > { %s784_s30 = sshll.u32 (!%p239_p2), %s779_s25, 4 }
   0x6   : > { %242 = sbr.rel (%p239_p2) target bundleno = 538 (0x21a), region = 48  ;;  %p271_p3 = scmp.lt.s32.totalorder (!%p239_p2), %s784_s30, 31 }
   0xb   : > { %v300_v0 = vld [vmem:[%s1126_s1 + $0x10] sm:$0xf]  ;;  %vm354_vm0 = vcmask 1043456   ;;  %v299_v1 = vld [vmem:[%s1126_s1 + $0x8] sm:$0xff]  ;;  %v298_v2 = vld [vmem:[%s1126_s1] sm:$0xff]  ;;  %s1134_s30 = smov (!%p271_p3, %s784_s30), 31 }
   0xc   : > { %788 = vmatpush.msk.msra.mxu0 %vm354_vm0, %v300_v0  ;;  %839 = vmatpush.msk.msra.mxu3 %vm354_vm0, %v300_v0  ;;  %s785_s10 = sshll.u32 %s1134_s30, 3  ;;  %vm305_vm1 = vcmask 162816   ;;  %v446_v13 = vld [vmem:[%s1128_s3 + $0x38] sm:$0xff]  ;;  %v445_v14 = vld [vmem:[%s1128_s3 + $0x30] sm:$0xff]  ;;  %v444_v15 = vld [vmem:[%s1128_s3 + $0x28] sm:$0xff]  ;;  %vm451_vm2 = vcmask 523264  }
   0xd   : > { %s942_s13 = scalar_lea.vmem %s1125_s0, %s785_s10  ;;  %508 = vmatpush.msra.mxu1 %v446_v13  ;;  %v443_v17 = vld [vmem:[%s1128_s3 + $0x20] sm:$0xff]  ;;  %v442_v19 = vld [vmem:[%s1128_s3 + $0x18] sm:$0xff]  ;;  %v441_v23 = vld [vmem:[%s1128_s3 + $0x10] sm:$0xff]  ;;  %s1088_s14 = scalar_lea.vmem %s1132_s7, %s785_s10  ;;  %vm706_vm3 = vcmask 15360  }
   0xe   : > { %372 = vmatpush.msra.mxu0 %v299_v1  ;;  %840 = vmatpush.msra.mxu3 %v299_v1  ;;  %v282_v3 = vld [vmem:[%s942_s13] sm:$0xff]  ;;  %v283_v4 = vld [vmem:[%s942_s13 + $0x8] sm:$0xff]  ;;  %v284_v5 = vld [vmem:[%s942_s13 + $0x10] sm:$0xff] }
   0xf   : > { %v285_v6 = vld [vmem:[%s942_s13 + $0x18] sm:$0xff]  ;;  %v286_v7 = vld [vmem:[%s942_s13 + $0x20] sm:$0xff]  ;;  %v287_v8 = vld [vmem:[%s942_s13 + $0x28] sm:$0xff]  ;;  %509 = vmatpush.msra.mxu1 %v445_v14 }
  0x10   : > { %373 = vmatpush.msra.mxu0 %v298_v2  ;;  %841 = vmatpush.msra.mxu3 %v298_v2  ;;  %v288_v9 = vld [vmem:[%s942_s13 + $0x30] sm:$0xff]  ;;  %v289_v10 = vld [vmem:[%s942_s13 + $0x38] sm:$0xff]  ;;  %v290_v11 = vld [vmem:[%s942_s13 + $0x40] sm:$0xff] }
  0x11   : > { %789 = vmatmul.msk.f32.vlgmr.msra.gmra.mxu0 %vm305_vm1, %v282_v3  ;;  %v295_v12 = vld [vmem:[%s942_s13 + $0x68] sm:$0xff]  ;;  %v296_v18 = vld [vmem:[%s942_s13 + $0x70] sm:$0xff]  ;;  %510 = vmatpush.msra.mxu1 %v444_v15  ;;  %v297_v21 = vld [vmem:[%s942_s13 + $0x78] sm:$0xff] }
  0x12   : > { %802 = vmatmul.msk.f32.vlgmr.msra.gmra.mxu3 %vm305_vm1, %v295_v12  ;;  %v291_v16 = vld [vmem:[%s942_s13 + $0x48] sm:$0xff]  ;;  %v292_v20 = vld [vmem:[%s942_s13 + $0x50] sm:$0xff]  ;;  %v293_v22 = vld [vmem:[%s942_s13 + $0x58] sm:$0xff] }
  0x13   : > { %842 = vmatpush.msrb.mxu3 %v446_v13  ;;  %511 = vmatpush.msra.mxu1 %v443_v17  ;;  %v294_v24 = vld [vmem:[%s942_s13 + $0x60] sm:$0xff]  ;;  %v440_v25 = vld [vmem:[%s1128_s3 + $0x8] sm:$0xff]  ;;  %v588_v61 = vld [vmem:[%s1130_s5 + $0x38] sm:$0xff] }
  0x14   : > { %v439_v26 = vld [vmem:[%s1128_s3] sm:$0xff]  ;;  %v587_v62 = vld [vmem:[%s1130_s5 + $0x30] sm:$0xff]  ;;  %649 = vmatpush.msra.mxu2 %v588_v61  ;;  %v586_v63 = vld [vmem:[%s1130_s5 + $0x28] sm:$0xff] }
  0x15   : > { %843 = vmatpush.msrb.mxu3 %v445_v14  ;;  %512 = vmatpush.msra.mxu1 %v442_v19  ;;  %v1003_v27 = vld [vmem:[%s1127_s2] ss:$0 sm:$0xff] }
  0x16   : > { %650 = vmatpush.msra.mxu2 %v587_v62  ;;  %v585_v3 = vld [vmem:[%s1130_s5 + $0x20] sm:$0xff] }
  0x17   : > { %844 = vmatpush.msrb.mxu3 %v444_v15  ;;  %513 = vmatpush.msra.mxu1 %v441_v23  ;;  %v581_v12 = vld [vmem:[%s1130_s5] sm:$0xff] }
  0x18   : > { %651 = vmatpush.msra.mxu2 %v586_v63 }
  0x19   : > { %790 = vmatmul.msk.f32.gmra.mxu0 %vm305_vm1, %v283_v4  ;;  %845 = vmatpush.msrb.mxu3 %v443_v17  ;;  %v584_v4 = vld [vmem:[%s1130_s5 + $0x18] sm:$0xff] }
  0x1a   : > { %803 = vmatmul.msk.f32.gmra.mxu3 %vm305_vm1, %v296_v18  ;;  %514 = vmatpush.msra.mxu1 %v440_v25 }
  0x1b   : > { %846 = vmatpush.msrb.mxu3 %v442_v19  ;;  %652 = vmatpush.msra.mxu2 %v585_v3 }
  0x1c   : > { %515 = vmatpush.msra.mxu1 %v439_v26 }
  0x1d   : > { %847 = vmatpush.msrb.mxu3 %v441_v23  ;;  %653 = vmatpush.msra.mxu2 %v584_v4 }
  0x1f   : > { %848 = vmatpush.msrb.mxu3 %v440_v25 }
  0x21   : > { %791 = vmatmul.msk.f32.gmra.mxu0 %vm305_vm1, %v284_v5  ;;  %849 = vmatpush.msrb.mxu3 %v439_v26 }
  0x22   : > { %804 = vmatmul.msk.f32.gmra.mxu3 %vm305_vm1, %v297_v21 }
  0x23   : > { %850 = vmatpush.msra.mxu3 %v588_v61 }
  0x25   : > { %851 = vmatpush.msra.mxu3 %v587_v62 }
  0x27   : > { %852 = vmatpush.msra.mxu3 %v586_v63 }
  0x29   : > { %792 = vmatmul.msk.f32.gmra.mxu0 %vm305_vm1, %v285_v6  ;;  %853 = vmatpush.msra.mxu3 %v585_v3 }
  0x2b   : > { %854 = vmatpush.msra.mxu3 %v584_v4 }
  0x31   : > { %793 = vmatmul.msk.f32.gmra.mxu0 %vm305_vm1, %v286_v7 }
  0x39   : > { %794 = vmatmul.msk.f32.gmra.mxu0 %vm305_vm1, %v287_v8  ;;  %v583_v8 = vld [vmem:[%s1130_s5 + $0x10] sm:$0xff] }
  0x3a   : > { %654 = vmatpush.msra.mxu2 %v583_v8  ;;  %855 = vmatpush.msra.mxu3 %v583_v8 }
  0x41   : > { %795 = vmatmul.msk.f32.gmra.mxu0 %vm305_vm1, %v288_v9 }
  0x49   : > { %796 = vmatmul.msk.f32.gmra.mxu0 %vm305_vm1, %v289_v10  ;;  %v582_v10 = vld [vmem:[%s1130_s5 + $0x8] sm:$0xff] }
  0x4a   : > { %655 = vmatpush.msra.mxu2 %v582_v10  ;;  %856 = vmatpush.msra.mxu3 %v582_v10 }
  0x4c   : > { %656 = vmatpush.msra.mxu2 %v581_v12  ;;  %857 = vmatpush.msra.mxu3 %v581_v12 }
  0x51   : > { %797 = vmatmul.msk.f32.gmra.mxu0 %vm305_vm1, %v290_v11 }
  0x59   : > { %798 = vmatmul.msk.f32.gmra.mxu0 %vm305_vm1, %v291_v16 }
  0x61   : > { %799 = vmatmul.msk.f32.gmra.mxu0 %vm305_vm1, %v292_v20  ;;  %v867_v20 = vld [vmem:[%s1129_s4] ss:$0 sm:$0xff] }
  0x69   : > { %800 = vmatmul.msk.f32.gmra.mxu0 %vm305_vm1, %v293_v22 }
  0x71   : > { %801 = vmatmul.msk.f32.gmra.mxu0 %vm305_vm1, %v294_v24 }
  0x8e   : > { %v375_v28 = vpop.f32.mrf.mxu0 }
  0x8f   : > { %v376_v29 = vadd.f32 %v1003_v27, %v375_v28 }
  0x91   : > { %v423_v30 = vmax.f32 %v376_v29, 0.0 }
  0x93   : > { %805 = vmatmul.msk.f32.vlgmr.msra.gmra.mxu1 %vm451_vm2, %v423_v30 }
  0x95   : > { %v414_v5 = vpop.f32.mrf.mxu3 }
  0x96   : > { %v378_v31 = vpop.f32.mrf.mxu0  ;;  %v415_v11 = vadd.f32 %v1003_v27, %v414_v5  ;;  %v868_v5 = vld [vmem:[%s1131_s6] ss:$0 sm:$0xff] }
  0x97   : > { %v379_v32 = vadd.f32 %v1003_v27, %v378_v31 }
  0x98   : > { %v436_v14 = vmax.f32 %v415_v11, 0.0 }
  0x99   : > { %v424_v33 = vmax.f32 %v379_v32, 0.0 }
  0x9b   : > { %806 = vmatmul.msk.f32.gmra.mxu1 %vm451_vm2, %v424_v33 }
  0x9d   : > { %v417_v13 = vpop.f32.mrf.mxu3 }
  0x9e   : > { %v381_v34 = vpop.f32.mrf.mxu0  ;;  %v418_v15 = vadd.f32 %v1003_v27, %v417_v13 }
  0x9f   : > { %v382_v35 = vadd.f32 %v1003_v27, %v381_v34 }
  0xa0   : > { %v437_v16 = vmax.f32 %v418_v15, 0.0 }
  0xa1   : > { %v425_v36 = vmax.f32 %v382_v35, 0.0 }
  0xa3   : > { %807 = vmatmul.msk.f32.gmra.mxu1 %vm451_vm2, %v425_v36 }
  0xa5   : > { %v420_v17 = vpop.f32.mrf.mxu3 }
  0xa6   : > { %v384_v37 = vpop.f32.mrf.mxu0  ;;  %v421_v18 = vadd.f32 %v1003_v27, %v420_v17 }
  0xa7   : > { %v385_v38 = vadd.f32 %v1003_v27, %v384_v37 }
  0xa8   : > { %v438_v19 = vmax.f32 %v421_v18, 0.0 }
  0xa9   : > { %v426_v39 = vmax.f32 %v385_v38, 0.0 }
  0xab   : > { %808 = vmatmul.msk.f32.gmra.mxu1 %vm451_vm2, %v426_v39 }
  0xae   : > { %v387_v40 = vpop.f32.mrf.mxu0 }
  0xaf   : > { %v388_v41 = vadd.f32 %v1003_v27, %v387_v40 }
  0xb1   : > { %v427_v42 = vmax.f32 %v388_v41, 0.0 }
  0xb3   : > { %809 = vmatmul.msk.f32.gmra.mxu1 %vm451_vm2, %v427_v42 }
  0xb6   : > { %v390_v43 = vpop.f32.mrf.mxu0 }
  0xb7   : > { %v391_v44 = vadd.f32 %v1003_v27, %v390_v43 }
  0xb9   : > { %v428_v45 = vmax.f32 %v391_v44, 0.0 }
  0xbb   : > { %810 = vmatmul.msk.f32.gmra.mxu1 %vm451_vm2, %v428_v45 }
  0xbe   : > { %v393_v46 = vpop.f32.mrf.mxu0 }
  0xbf   : > { %v394_v47 = vadd.f32 %v1003_v27, %v393_v46 }
  0xc1   : > { %v429_v48 = vmax.f32 %v394_v47, 0.0 }
  0xc3   : > { %811 = vmatmul.msk.f32.gmra.mxu1 %vm451_vm2, %v429_v48 }
  0xc6   : > { %v396_v49 = vpop.f32.mrf.mxu0 }
  0xc7   : > { %v397_v50 = vadd.f32 %v1003_v27, %v396_v49 }
  0xc9   : > { %v430_v51 = vmax.f32 %v397_v50, 0.0 }
  0xcb   : > { %812 = vmatmul.msk.f32.gmra.mxu1 %vm451_vm2, %v430_v51 }
  0xce   : > { %v399_v52 = vpop.f32.mrf.mxu0 }
  0xcf   : > { %v400_v53 = vadd.f32 %v1003_v27, %v399_v52 }
  0xd1   : > { %v431_v54 = vmax.f32 %v400_v53, 0.0 }
  0xd3   : > { %813 = vmatmul.msk.f32.gmra.mxu1 %vm451_vm2, %v431_v54 }
  0xd6   : > { %v402_v55 = vpop.f32.mrf.mxu0 }
  0xd7   : > { %v403_v56 = vadd.f32 %v1003_v27, %v402_v55 }
  0xd9   : > { %v432_v57 = vmax.f32 %v403_v56, 0.0 }
  0xdb   : > { %814 = vmatmul.msk.f32.gmra.mxu1 %vm451_vm2, %v432_v57 }
  0xde   : > { %v405_v58 = vpop.f32.mrf.mxu0 }
  0xdf   : > { %v406_v59 = vadd.f32 %v1003_v27, %v405_v58 }
  0xe1   : > { %v433_v60 = vmax.f32 %v406_v59, 0.0 }
  0xe3   : > { %815 = vmatmul.msk.f32.gmra.mxu1 %vm451_vm2, %v433_v60 }
  0xe6   : > { %v408_v0 = vpop.f32.mrf.mxu0 }
  0xe7   : > { %v409_v1 = vadd.f32 %v1003_v27, %v408_v0 }
  0xe9   : > { %v434_v2 = vmax.f32 %v409_v1, 0.0 }
  0xeb   : > { %816 = vmatmul.msk.f32.gmra.mxu1 %vm451_vm2, %v434_v2 }
  0xee   : > { %v411_v6 = vpop.f32.mrf.mxu0 }
  0xef   : > { %v412_v7 = vadd.f32 %v1003_v27, %v411_v6 }
  0xf1   : > { %v435_v9 = vmax.f32 %v412_v7, 0.0 }
  0xf3   : > { %817 = vmatmul.msk.f32.vlgmr.msrb.gmra.mxu3 %vm451_vm2, %v435_v9 }
  0xfb   : > { %818 = vmatmul.msk.f32.gmra.mxu3 %vm451_vm2, %v436_v14 }
 0x103   : > { %819 = vmatmul.msk.f32.gmra.mxu3 %vm451_vm2, %v437_v16 }
 0x10b   : > { %820 = vmatmul.msk.f32.gmra.mxu3 %vm451_vm2, %v438_v19 }
 0x110   : > { %v517_v21 = vpop.f32.mrf.mxu1 }
 0x111   : > { %v518_v22 = vadd.f32 %v867_v20, %v517_v21 }
 0x113   : > { %v565_v23 = vmax.f32 %v518_v22, 0.0 }
 0x115   : > { %821 = vmatmul.msk.f32.vlgmr.msra.gmra.mxu2 %vm451_vm2, %v565_v23 }
 0x118   : > { %v520_v24 = vpop.f32.mrf.mxu1 }
 0x119   : > { %v521_v25 = vadd.f32 %v867_v20, %v520_v24 }
 0x11b   : > { %v566_v26 = vmax.f32 %v521_v25, 0.0 }
 0x11d   : > { %822 = vmatmul.msk.f32.gmra.mxu2 %vm451_vm2, %v566_v26 }
 0x120   : > { %v523_v28 = vpop.f32.mrf.mxu1 }
 0x121   : > { %v524_v29 = vadd.f32 %v867_v20, %v523_v28 }
 0x123   : > { %v567_v27 = vmax.f32 %v524_v29, 0.0 }
 0x125   : > { %823 = vmatmul.msk.f32.gmra.mxu2 %vm451_vm2, %v567_v27 }
 0x128   : > { %v526_v30 = vpop.f32.mrf.mxu1 }
 0x129   : > { %v527_v31 = vadd.f32 %v867_v20, %v526_v30 }
 0x12b   : > { %v568_v32 = vmax.f32 %v527_v31, 0.0 }
 0x12d   : > { %824 = vmatmul.msk.f32.gmra.mxu2 %vm451_vm2, %v568_v32 }
 0x130   : > { %v529_v33 = vpop.f32.mrf.mxu1 }
 0x131   : > { %v530_v34 = vadd.f32 %v867_v20, %v529_v33 }
 0x133   : > { %v569_v35 = vmax.f32 %v530_v34, 0.0 }
 0x135   : > { %825 = vmatmul.msk.f32.gmra.mxu2 %vm451_vm2, %v569_v35 }
 0x138   : > { %v532_v36 = vpop.f32.mrf.mxu1 }
 0x139   : > { %v533_v37 = vadd.f32 %v867_v20, %v532_v36 }
 0x13b   : > { %v570_v38 = vmax.f32 %v533_v37, 0.0 }
 0x13d   : > { %826 = vmatmul.msk.f32.gmra.mxu2 %vm451_vm2, %v570_v38 }
 0x140   : > { %v535_v39 = vpop.f32.mrf.mxu1 }
 0x141   : > { %v536_v40 = vadd.f32 %v867_v20, %v535_v39 }
 0x143   : > { %v571_v41 = vmax.f32 %v536_v40, 0.0 }
 0x145   : > { %827 = vmatmul.msk.f32.gmra.mxu2 %vm451_vm2, %v571_v41 }
 0x148   : > { %v538_v42 = vpop.f32.mrf.mxu1 }
 0x149   : > { %v539_v43 = vadd.f32 %v867_v20, %v538_v42 }
 0x14b   : > { %v572_v44 = vmax.f32 %v539_v43, 0.0 }
 0x14d   : > { %828 = vmatmul.msk.f32.gmra.mxu2 %vm451_vm2, %v572_v44 }
 0x150   : > { %v541_v45 = vpop.f32.mrf.mxu1 }
 0x151   : > { %v542_v46 = vadd.f32 %v867_v20, %v541_v45 }
 0x153   : > { %v573_v47 = vmax.f32 %v542_v46, 0.0 }
 0x155   : > { %829 = vmatmul.msk.f32.gmra.mxu2 %vm451_vm2, %v573_v47 }
 0x158   : > { %v544_v48 = vpop.f32.mrf.mxu1 }
 0x159   : > { %v545_v49 = vadd.f32 %v867_v20, %v544_v48 }
 0x15b   : > { %v574_v50 = vmax.f32 %v545_v49, 0.0 }
 0x15d   : > { %830 = vmatmul.msk.f32.gmra.mxu2 %vm451_vm2, %v574_v50 }
 0x160   : > { %v547_v51 = vpop.f32.mrf.mxu1 }
 0x161   : > { %v548_v52 = vadd.f32 %v867_v20, %v547_v51 }
 0x163   : > { %v575_v53 = vmax.f32 %v548_v52, 0.0 }
 0x165   : > { %831 = vmatmul.msk.f32.gmra.mxu2 %vm451_vm2, %v575_v53 }
 0x168   : > { %v550_v54 = vpop.f32.mrf.mxu1 }
 0x169   : > { %v551_v55 = vadd.f32 %v867_v20, %v550_v54 }
 0x16b   : > { %v576_v56 = vmax.f32 %v551_v55, 0.0 }
 0x16d   : > { %832 = vmatmul.msk.f32.gmra.mxu2 %vm451_vm2, %v576_v56 }
 0x176   : > { %v553_v57 = vpop.f32.mrf.mxu3 }
 0x177   : > { %v554_v58 = vadd.f32 %v867_v20, %v553_v57 }
 0x179   : > { %v577_v59 = vmax.f32 %v554_v58, 0.0 }
 0x17b   : > { %833 = vmatmul.msk.f32.vlgmr.msra.gmra.mxu3 %vm451_vm2, %v577_v59 }
 0x17e   : > { %v556_v60 = vpop.f32.mrf.mxu3 }
 0x17f   : > { %v557_v61 = vadd.f32 %v867_v20, %v556_v60 }
 0x181   : > { %v578_v62 = vmax.f32 %v557_v61, 0.0 }
 0x183   : > { %834 = vmatmul.msk.f32.gmra.mxu3 %vm451_vm2, %v578_v62 }
 0x186   : > { %v559_v63 = vpop.f32.mrf.mxu3 }
 0x187   : > { %v560_v0 = vadd.f32 %v867_v20, %v559_v63 }
 0x189   : > { %v579_v1 = vmax.f32 %v560_v0, 0.0 }
 0x18b   : > { %835 = vmatmul.msk.f32.gmra.mxu3 %vm451_vm2, %v579_v1 }
 0x18e   : > { %v562_v2 = vpop.f32.mrf.mxu3 }
 0x18f   : > { %v563_v3 = vadd.f32 %v867_v20, %v562_v2 }
 0x191   : > { %v580_v4 = vmax.f32 %v563_v3, 0.0 }
 0x193   : > { %836 = vmatmul.msk.f32.gmra.mxu3 %vm451_vm2, %v580_v4 }
 0x198   : > { %v658_v6 = vpop.f32.mrf.mxu2 }
 0x199   : > { %v659_v7 = vadd.f32 %v868_v5, %v658_v6 }
 0x19b   : > { %707 = vst.msk [vmem:[%s1088_s14] sm:$0xff] %vm706_vm3, %v659_v7 }
 0x1a0   : > { %v661_v8 = vpop.f32.mrf.mxu2 }
 0x1a1   : > { %v662_v9 = vadd.f32 %v868_v5, %v661_v8 }
 0x1a3   : > { %708 = vst.msk [vmem:[%s1088_s14 + $0x8] sm:$0xff] %vm706_vm3, %v662_v9 }
 0x1a8   : > { %v664_v10 = vpop.f32.mrf.mxu2 }
 0x1a9   : > { %v665_v11 = vadd.f32 %v868_v5, %v664_v10 }
 0x1ab   : > { %709 = vst.msk [vmem:[%s1088_s14 + $0x10] sm:$0xff] %vm706_vm3, %v665_v11 }
 0x1b0   : > { %v667_v12 = vpop.f32.mrf.mxu2 }
 0x1b1   : > { %v668_v13 = vadd.f32 %v868_v5, %v667_v12 }
 0x1b3   : > { %710 = vst.msk [vmem:[%s1088_s14 + $0x18] sm:$0xff] %vm706_vm3, %v668_v13 }
 0x1b8   : > { %v670_v14 = vpop.f32.mrf.mxu2 }
 0x1b9   : > { %v671_v15 = vadd.f32 %v868_v5, %v670_v14 }
 0x1bb   : > { %711 = vst.msk [vmem:[%s1088_s14 + $0x20] sm:$0xff] %vm706_vm3, %v671_v15 }
 0x1c0   : > { %v673_v16 = vpop.f32.mrf.mxu2 }
 0x1c1   : > { %v674_v17 = vadd.f32 %v868_v5, %v673_v16 }
 0x1c3   : > { %712 = vst.msk [vmem:[%s1088_s14 + $0x28] sm:$0xff] %vm706_vm3, %v674_v17 }
 0x1c8   : > { %v676_v18 = vpop.f32.mrf.mxu2 }
 0x1c9   : > { %v677_v19 = vadd.f32 %v868_v5, %v676_v18 }
 0x1cb   : > { %713 = vst.msk [vmem:[%s1088_s14 + $0x30] sm:$0xff] %vm706_vm3, %v677_v19 }
 0x1d0   : > { %v679_v20 = vpop.f32.mrf.mxu2 }
 0x1d1   : > { %v680_v21 = vadd.f32 %v868_v5, %v679_v20 }
 0x1d3   : > { %714 = vst.msk [vmem:[%s1088_s14 + $0x38] sm:$0xff] %vm706_vm3, %v680_v21 }
 0x1d8   : > { %v682_v22 = vpop.f32.mrf.mxu2 }
 0x1d9   : > { %v683_v23 = vadd.f32 %v868_v5, %v682_v22 }
 0x1db   : > { %715 = vst.msk [vmem:[%s1088_s14 + $0x40] sm:$0xff] %vm706_vm3, %v683_v23 }
 0x1e0   : > { %v685_v24 = vpop.f32.mrf.mxu2 }
 0x1e1   : > { %v686_v25 = vadd.f32 %v868_v5, %v685_v24 }
 0x1e3   : > { %716 = vst.msk [vmem:[%s1088_s14 + $0x48] sm:$0xff] %vm706_vm3, %v686_v25 }
 0x1e8   : > { %v688_v26 = vpop.f32.mrf.mxu2 }
 0x1e9   : > { %v689_v28 = vadd.f32 %v868_v5, %v688_v26 }
 0x1eb   : > { %717 = vst.msk [vmem:[%s1088_s14 + $0x50] sm:$0xff] %vm706_vm3, %v689_v28 }
 0x1f0   : > { %v691_v29 = vpop.f32.mrf.mxu2 }
 0x1f1   : > { %v692_v27 = vadd.f32 %v868_v5, %v691_v29 }
 0x1f3   : > { %718 = vst.msk [vmem:[%s1088_s14 + $0x58] sm:$0xff] %vm706_vm3, %v692_v27 }
 0x1fe   : > { %v694_v30 = vpop.f32.mrf.mxu3 }
 0x1ff   : > { %v695_v31 = vadd.f32 %v868_v5, %v694_v30 }
 0x201   : > { %719 = vst.msk [vmem:[%s1088_s14 + $0x60] sm:$0xff] %vm706_vm3, %v695_v31 }
 0x206   : > { %v697_v32 = vpop.f32.mrf.mxu3 }
 0x207   : > { %v698_v33 = vadd.f32 %v868_v5, %v697_v32 }
 0x209   : > { %720 = vst.msk [vmem:[%s1088_s14 + $0x68] sm:$0xff] %vm706_vm3, %v698_v33 }
 0x20e   : > { %v700_v34 = vpop.f32.mrf.mxu3 }
 0x20f   : > { %v701_v35 = vadd.f32 %v868_v5, %v700_v34 }
 0x211   : > { %721 = vst.msk [vmem:[%s1088_s14 + $0x70] sm:$0xff] %vm706_vm3, %v701_v35 }
 0x216   : > { %v703_v36 = vpop.f32.mrf.mxu3 }
 0x217   : > { %v704_v37 = vadd.f32 %v868_v5, %v703_v36 }
 0x219   : > { %722 = vst.msk [vmem:[%s1088_s14 + $0x78] sm:$0xff] %vm706_vm3, %v704_v37 }
 0x21a PF: > { %s17_s24 = sadd.s32 1, %s875_s24  }
 0x21b   : > { %p14_p4 = scmp.ge.s32.totalorder %s17_s24, 4  }
 0x21d   :  { %16 = sbr.rel (!%p14_p4) target bundleno = 1 (0x1), region = 78 }

</bundles_post_ra>
